<compile_context>
chip_gen: v7x
topology: tpu7x:2x2x1
jax: 0.10.0
libtpu: 0.0.40
codegen_flags: <defaults>
</compile_context>

<pallas_src>
import jax
import jax.numpy as jnp
from jax.experimental import pallas as pl
from jax.experimental.pallas import tpu as pltpu


def _round_up(x, m):
    return (x + m - 1) // m * m


def _make_bigram_kernel(*, vocab, n_tokens, tile_n, vocab_pad):
    V, N, TN, VP = vocab, n_tokens, tile_n, vocab_pad

    def kernel(idx_ref, tgt_ref, table_ref, logits_ref, part_ref):
        i = pl.program_id(0)
        base = i * TN

        # Dynamic-row gather from the VMEM-resident table straight into the
        # lane-dense logits output tile.  Source row index comes from SMEM.
        def gather_row(r, carry):
            src = idx_ref[base + r]                       # SMEM scalar read
            logits_ref[pl.ds(r, 1), :] = table_ref[pl.ds(src, 1), :]
            return carry

        jax.lax.fori_loop(0, TN, gather_row, 0)

        rows = logits_ref[...]                            # (TN, VP) f32 logits

        # Cross-entropy over the real vocab columns only (padded cols masked).
        col = jax.lax.broadcasted_iota(jnp.int32, (TN, VP), 1)
        masked = jnp.where(col < V, rows, jnp.float32(-1e30))
        m = jnp.max(masked, axis=-1, keepdims=True)
        lse = m + jnp.log(jnp.sum(jnp.exp(masked - m), axis=-1, keepdims=True))

        # Single broadcast compare against the (TN, 1) targets block.
        tgt_col = tgt_ref[...]                            # (TN, 1) int32
        tgt_logit = jnp.sum(jnp.where(col == tgt_col, rows, 0.0),
                            axis=-1, keepdims=True)

        nll = lse - tgt_logit                             # (TN, 1)
        row_global = jax.lax.broadcasted_iota(jnp.int32, (TN, 1), 0) + base
        valid = (row_global < N).astype(jnp.float32)      # mask padded rows

        # Per-tile partial sum (mean taken in the wrapper) -> grid axis stays
        # "parallel" (no carried accumulator).
        part_ref[...] = jnp.sum(nll * valid, axis=0, keepdims=True)

    return kernel


def bigram_forward(idx, targets, table, *, tile_n=256):
    """Mirrors BigramLanguageModel.forward with targets provided.

    idx, targets: int (B, T); table: float32 (V, V).
    Returns (logits (B*T, V) float32, scalar mean cross-entropy loss).
    """
    B, T = idx.shape
    V = table.shape[0]
    N = B * T
    VP = _round_up(V, 128)                 # lane-dense vocab axis
    NP = _round_up(N, tile_n)              # row tiles of TILE_N
    num_tiles = NP // tile_n

    table_p = jnp.zeros((VP, VP), jnp.float32).at[:V, :V].set(
        table.astype(jnp.float32))
    idx_flat = jnp.zeros((NP,), jnp.int32).at[:N].set(
        idx.reshape(-1).astype(jnp.int32))
    tgt_col = jnp.zeros((NP, 1), jnp.int32).at[:N, 0].set(
        targets.reshape(-1).astype(jnp.int32))

    kernel = _make_bigram_kernel(vocab=V, n_tokens=N, tile_n=tile_n,
                                 vocab_pad=VP)

    logits_p, partials = pl.pallas_call(
        kernel,
        out_shape=(
            jax.ShapeDtypeStruct((NP, VP), jnp.float32),       # padded logits
            jax.ShapeDtypeStruct((num_tiles, 1), jnp.float32),  # per-tile NLL
        ),
        grid_spec=pltpu.PrefetchScalarGridSpec(
            num_scalar_prefetch=1,                             # idx -> SMEM
            grid=(num_tiles,),
            in_specs=[
                # targets: one (tile_n, 1) block per grid step.
                pl.BlockSpec((tile_n, 1), lambda i, idx_r: (i, 0)),
                # padded table: resident in VMEM (constant block index).
                pl.BlockSpec((VP, VP), lambda i, idx_r: (0, 0)),
            ],
            out_specs=(
                pl.BlockSpec((tile_n, VP), lambda i, idx_r: (i, 0)),
                pl.BlockSpec((1, 1), lambda i, idx_r: (i, 0)),
            ),
        ),
        compiler_params=pltpu.CompilerParams(
            dimension_semantics=("parallel",)),
    )(idx_flat, tgt_col, table_p)

    loss = jnp.sum(partials) * jnp.float32(1.0 / N)
    return logits_p[:N, :V], loss


if __name__ == "__main__":
    # Derive vocab from an in-script corpus, like the original module.
    text = "the quick brown fox jumps over the lazy dog"
    chars = sorted(list(set(text)))
    vocab_size = len(chars)

    key = jax.random.PRNGKey(0)
    k_table, k_idx, k_tgt = jax.random.split(key, 3)

    # nn.Embedding default init ~ N(0, 1).
    table = jax.random.normal(k_table, (vocab_size, vocab_size), dtype=jnp.float32)

    B, T = 2, 8
    idx = jax.random.randint(k_idx, (B, T), 0, vocab_size, dtype=jnp.int32)
    targets = jax.random.randint(k_tgt, (B, T), 0, vocab_size, dtype=jnp.int32)

    logits, loss = bigram_forward(idx, targets, table)
    jax.block_until_ready((logits, loss))

    # Reference check in plain JAX.
    ref_logits = table[idx.reshape(-1)]
    ref_lse = jax.scipy.special.logsumexp(ref_logits, axis=-1)
    ref_loss = jnp.mean(ref_lse - ref_logits[jnp.arange(B * T), targets.reshape(-1)])
    assert logits.shape == (B * T, vocab_size)
    assert jnp.allclose(logits, ref_logits, atol=1e-5)
    assert jnp.allclose(loss, ref_loss, atol=1e-5)

    print("KERNEL_OK")
</pallas_src>

<mosaic_0001>
module attributes {stable_mosaic.version = 11 : i64} {
  func.func @kernel(%arg0: i32, %arg1: memref<256xi32, #tpu.memory_space<smem>>, %arg2: memref<256x1xi32, #tpu.memory_space<vmem>>, %arg3: memref<128x128xf32, #tpu.memory_space<vmem>>, %arg4: memref<256x128xf32, #tpu.memory_space<vmem>>, %arg5: memref<1x1xf32, #tpu.memory_space<vmem>>) attributes {dimension_semantics = [#tpu.dimension_semantics<parallel>], iteration_bounds = array<i64: 1>, scalar_prefetch = 1 : i64, scratch_operands = 0 : i64, tpu.core_type = #tpu.core_type<tc>, window_params = [{transform_indices = @transform_0, window_bounds = array<i64: 256, 1>}, {pipeline_mode = #tpu.pipeline_mode<synchronous>, transform_indices = @transform_1, window_bounds = array<i64: 128, 128>}, {transform_indices = @transform_2, window_bounds = array<i64: 256, 128>}, {transform_indices = @transform_3, window_bounds = array<i64: 1, 1>}]} {
    %c256_i32 = arith.constant 256 : i32
    %0 = arith.muli %arg0, %c256_i32 : i32
    %c0_i32 = arith.constant 0 : i32
    %c256_i32_0 = arith.constant 256 : i32
    %1 = arith.addi %c0_i32, %c256_i32_0 : i32
    %c1_i32 = arith.constant 1 : i32
    scf.for %arg6 = %c0_i32 to %1 step %c1_i32  : i32 {
      %36 = arith.addi %0, %arg6 : i32
      %37 = arith.index_cast %36 : i32 to index
      %38 = memref.load %arg1[%37] : memref<256xi32, #tpu.memory_space<smem>>
      %39 = arith.index_cast %38 : i32 to index
      %c0_12 = arith.constant 0 : index
      %40 = vector.load %arg3[%39, %c0_12] : memref<128x128xf32, #tpu.memory_space<vmem>>, vector<1x128xf32>
      %41 = arith.index_cast %arg6 : i32 to index
      %c0_13 = arith.constant 0 : index
      %42 = vector.load %arg4[%41, %c0_13] : memref<256x128xf32, #tpu.memory_space<vmem>>, vector<1x128xf32>
      tpu.vector_store %arg4[%41, %c0_13], %40 {strides = array<i32>} : memref<256x128xf32, #tpu.memory_space<vmem>>, vector<1x128xf32>,
    }
    %c256_i32_1 = arith.constant 256 : i32
    %c0 = arith.constant 0 : index
    %c0_2 = arith.constant 0 : index
    %2 = vector.load %arg4[%c0, %c0_2] : memref<256x128xf32, #tpu.memory_space<vmem>>, vector<256x128xf32>
    %3 = tpu.iota {dimensions = array<i32: 1>} : vector<256x128xi32>
    %c27_i32 = arith.constant 27 : i32
    %4 = vector.broadcast %c27_i32 : i32 to vector<256x128xi32>
    %5 = arith.cmpi slt, %3, %4 : vector<256x128xi32>
    %cst = arith.constant -1.000000e+30 : f32
    %6 = vector.broadcast %cst : f32 to vector<256x128xf32>
    %7 = arith.select %5, %2, %6 : vector<256x128xi1>, vector<256x128xf32>
    %cst_3 = arith.constant dense<0xFF800000> : vector<256xf32>
    %8 = vector.multi_reduction <maximumf>, %7, %cst_3 [1] : vector<256x128xf32> to vector<256xf32>
    %9 = vector.shape_cast %8 : vector<256xf32> to vector<256x1xf32>
    %10 = vector.broadcast %9 : vector<256x1xf32> to vector<256x128xf32>
    %11 = arith.subf %7, %10 : vector<256x128xf32>
    %12 = math.exp %11 : vector<256x128xf32>
    %cst_4 = arith.constant dense<0.000000e+00> : vector<256xf32>
    %13 = vector.multi_reduction <add>, %12, %cst_4 [1] : vector<256x128xf32> to vector<256xf32>
    %14 = vector.shape_cast %13 : vector<256xf32> to vector<256x1xf32>
    %15 = math.log %14 : vector<256x1xf32>
    %16 = arith.addf %9, %15 : vector<256x1xf32>
    %c0_5 = arith.constant 0 : index
    %c0_6 = arith.constant 0 : index
    %17 = vector.load %arg2[%c0_5, %c0_6] : memref<256x1xi32, #tpu.memory_space<vmem>>, vector<256x1xi32>
    %18 = vector.broadcast %17 : vector<256x1xi32> to vector<256x128xi32>
    %19 = arith.cmpi eq, %3, %18 : vector<256x128xi32>
    %cst_7 = arith.constant 0.000000e+00 : f32
    %20 = vector.broadcast %cst_7 : f32 to vector<256x128xf32>
    %21 = arith.select %19, %2, %20 : vector<256x128xi1>, vector<256x128xf32>
    %cst_8 = arith.constant dense<0.000000e+00> : vector<256xf32>
    %22 = vector.multi_reduction <add>, %21, %cst_8 [1] : vector<256x128xf32> to vector<256xf32>
    %23 = vector.shape_cast %22 : vector<256xf32> to vector<256x1xf32>
    %24 = arith.subf %16, %23 : vector<256x1xf32>
    %25 = tpu.iota {dimensions = array<i32: 0>} : vector<256x1xi32>
    %26 = vector.broadcast %0 : i32 to vector<256x1xi32>
    %27 = arith.addi %25, %26 : vector<256x1xi32>
    %c16_i32 = arith.constant 16 : i32
    %28 = vector.broadcast %c16_i32 : i32 to vector<256x1xi32>
    %29 = arith.cmpi slt, %27, %28 : vector<256x1xi32>
    %30 = arith.extui %29 : vector<256x1xi1> to vector<256x1xi32>
    %31 = arith.sitofp %30 : vector<256x1xi32> to vector<256x1xf32>
    %32 = arith.mulf %24, %31 : vector<256x1xf32>
    %cst_9 = arith.constant dense<0.000000e+00> : vector<1xf32>
    %33 = vector.multi_reduction <add>, %32, %cst_9 [0] : vector<256x1xf32> to vector<1xf32>
    %34 = vector.shape_cast %33 : vector<1xf32> to vector<1x1xf32>
    %c0_10 = arith.constant 0 : index
    %c0_11 = arith.constant 0 : index
    %35 = vector.load %arg5[%c0_10, %c0_11] : memref<1x1xf32, #tpu.memory_space<vmem>>, vector<1x1xf32>
    tpu.vector_store %arg5[%c0_10, %c0_11], %34 {strides = array<i32>} : memref<1x1xf32, #tpu.memory_space<vmem>>, vector<1x1xf32>,
    return
  }
  func.func @transform_0(%arg0: i32, %arg1: memref<256xi32, #tpu.memory_space<smem>>) -> (i32, i32) {
    %c0_i32 = arith.constant 0 : i32
    %c0_i32_0 = arith.constant 0 : i32
    return %arg0, %c0_i32 : i32, i32
  }
  func.func @transform_1(%arg0: i32, %arg1: memref<256xi32, #tpu.memory_space<smem>>) -> (i32, i32) {
    %c0_i32 = arith.constant 0 : i32
    %c0_i32_0 = arith.constant 0 : i32
    %c0_i32_1 = arith.constant 0 : i32
    return %c0_i32, %c0_i32_0 : i32, i32
  }
  func.func @transform_2(%arg0: i32, %arg1: memref<256xi32, #tpu.memory_space<smem>>) -> (i32, i32) {
    %c0_i32 = arith.constant 0 : i32
    %c0_i32_0 = arith.constant 0 : i32
    return %arg0, %c0_i32 : i32, i32
  }
  func.func @transform_3(%arg0: i32, %arg1: memref<256xi32, #tpu.memory_space<smem>>) -> (i32, i32) {
    %c0_i32 = arith.constant 0 : i32
    %c0_i32_0 = arith.constant 0 : i32
    return %arg0, %c0_i32 : i32, i32
  }
}

</mosaic_0001>

<bundles_post_ra>
// kernel: tpu_custom_call.1
= control target key start
LH: loop header
LB: loop body
LE: loop exit
PB: predicated region body
PF: predicated region fallthrough
CT: control target
= control target key end

     0   :  { %s1930_s0 = inlined_call_operand.vmem [shape: s32[256], index: 0, kind: input, shape index: {}]   ;;  %s1931_s1 = inlined_call_operand.vmem [shape: s32[256,1], index: 1, kind: input, shape index: {}]   ;;  %s1932_s2 = inlined_call_operand.vmem [shape: f32[128,128], index: 2, kind: input, shape index: {}]   ;;  %s1933_s3 = inlined_call_operand.hbm [shape: f32[256,128], index: 3, kind: output, shape index: {0}]   ;;  %s1934_s4 = inlined_call_operand.hbm [shape: f32[1,1], index: 4, kind: output, shape index: {1}]  }
   0x1   :  { %s10_s17 = sshll.u32 %s1930_s0, 4  ;;  %s11_s17 = int_to_ptr.vmem [resolvable:$true] %s10_s17 }
   0x2   :  { %s1124_s18 = scalar_lea.vmem %s11_s17, 32  ;;  %p1129_p1 = scmp.lt.s32.totalorder %s11_s17, %s11_s17 }
   0x3   :  { %p1125_p0 = scmp.ne.s32.totalorder %s11_s17, %s1124_s18  ;;  %p1130_p2 = scmp.lt.s32.totalorder %s1124_s18, %s1124_s18 }
   0x5   :  { %p1131_p3 = por %p1130_p2, %p1129_p1 }
   0x7   :  { %p1132_p4 = pnand %p1131_p3, %p1125_p0 }
   0x9   :  { %1135 = shalt.err (!%p1132_p4)  }
   0xa   :  { %s1194_s19 = smov [#allocation3]  }
   0xb   :  { %13 = dma.vmem_to_smem %s11_s17, 32, %s1194_s19, [#allocation2] }
   0xc   :  { %1184 = dma.done.wait [#allocation2], 32 }
   0xd   :  { %1185 = vsyncadd [#allocation2], 4294967264 }
   0xe   :  { %15 = sfence }
   0xf   :  { %16 = vsyncpa [#allocation5], 0 }
  0x10   :  { %17 = vsyncpa [#allocation7], 0  ;;  %s1190_s20 = smov 0  }
  0x11 LB: > { %s30_s0 = sld [smem:[#allocation3 + %s1192_s20]]  ;;  %s33_s24 = scalar_lea.vmem [#allocation4], %s1192_s20  ;;  %s1192_s20 = sphi %s1190_s20, %s28_s20  }
  0x12   : > { %s28_s20 = sadd.s32 1, %s1192_s20  }
  0x13   : > { %p25_p5 = scmp.ge.s32.totalorder %s28_s20, 256  }
  0x14   :  { %v67_v1 = vlaneseq (%p25_p5) }
  0x15   :  { %27 = sbr.rel (!%p25_p5) target bundleno = 17 (0x11), region = 45 }
  0x16   :  { %v1233_v3 = vand.u32 (%p25_p5), 127, %v67_v1 }
  0x17   : > { %s31_s23 = scalar_lea.vmem %s1932_s2, %s30_s0 }
  0x18   : > { %v32_v0 = vld [vmem:[%s31_s23] sm:$0x1]  ;;  %vm69_vm0 = vcmp.lt.s32.totalorder (%p25_p5), %v1233_v3, 27 }
  0x19   : > { %34 = vst [vmem:[%s33_s24] sm:$0x1] %v32_v0 }
  0x20   :  { %v1231_v2 = vld [vmem:[#allocation4] sm:$0xff]  ;;  %v1235_v4 = vld [vmem:[#allocation4 + $0x10] sm:$0xff]  ;;  %v1238_v5 = vld [vmem:[#allocation4 + $0x8] sm:$0xff] }
  0x21   :  { %v1240_v6 = vld [vmem:[#allocation4 + $0x18] sm:$0xff]  ;;  %v1245_v7 = vsel %vm69_vm0, %v1231_v2, -1e+30  ;;  %v1250_v8 = vsel %vm69_vm0, %v1235_v4, -1e+30  ;;  %v1264_v11 = vld [vmem:[#allocation4 + $0x20] sm:$0xff] }
  0x22   :  { %102 = vmax.xlane.f32.xlu0 %v1245_v7  ;;  %106 = vmax.xlane.f32.xlu1 %v1250_v8  ;;  %v1257_v9 = vsel %vm69_vm0, %v1238_v5, -1e+30  ;;  %v1262_v10 = vsel %vm69_vm0, %v1240_v6, -1e+30  ;;  %v1266_v12 = vld [vmem:[#allocation4 + $0x28] sm:$0xff]  ;;  %v1280_v15 = vld [vmem:[#allocation4 + $0x30] sm:$0xff] }
  0x23   :  { %v1273_v13 = vsel %vm69_vm0, %v1264_v11, -1e+30  ;;  %v1278_v14 = vsel %vm69_vm0, %v1266_v12, -1e+30  ;;  %v1282_v16 = vld [vmem:[#allocation4 + $0x38] sm:$0xff]  ;;  %v1296_v19 = vld [vmem:[#allocation4 + $0x40] sm:$0xff] }
  0x24   :  { %v1289_v17 = vsel %vm69_vm0, %v1280_v15, -1e+30  ;;  %v1294_v18 = vsel %vm69_vm0, %v1282_v16, -1e+30  ;;  %v1298_v20 = vld [vmem:[#allocation4 + $0x48] sm:$0xff]  ;;  %v1312_v23 = vld [vmem:[#allocation4 + $0x50] sm:$0xff] }
  0x25   :  { %v1305_v21 = vsel %vm69_vm0, %v1296_v19, -1e+30  ;;  %v1310_v22 = vsel %vm69_vm0, %v1298_v20, -1e+30  ;;  %v1314_v24 = vld [vmem:[#allocation4 + $0x58] sm:$0xff]  ;;  %v1328_v27 = vld [vmem:[#allocation4 + $0x60] sm:$0xff] }
  0x26   :  { %104 = vmax.xlane.f32.xlu0 %v1257_v9  ;;  %108 = vmax.xlane.f32.xlu1 %v1262_v10  ;;  %v1321_v25 = vsel %vm69_vm0, %v1312_v23, -1e+30  ;;  %v1326_v26 = vsel %vm69_vm0, %v1314_v24, -1e+30  ;;  %v1330_v28 = vld [vmem:[#allocation4 + $0x68] sm:$0xff]  ;;  %v1344_v31 = vld [vmem:[#allocation4 + $0x70] sm:$0xff] }
  0x27   :  { %v1337_v29 = vsel %vm69_vm0, %v1328_v27, -1e+30  ;;  %v1342_v30 = vsel %vm69_vm0, %v1330_v28, -1e+30  ;;  %v1346_v32 = vld [vmem:[#allocation4 + $0x78] sm:$0xff]  ;;  %v1360_v35 = vld [vmem:[#allocation4 + $0x80] sm:$0xff] }
  0x28   :  { %v1353_v33 = vsel %vm69_vm0, %v1344_v31, -1e+30  ;;  %v1358_v34 = vsel %vm69_vm0, %v1346_v32, -1e+30  ;;  %v1362_v36 = vld [vmem:[#allocation4 + $0x88] sm:$0xff]  ;;  %v1376_v39 = vld [vmem:[#allocation4 + $0x90] sm:$0xff] }
  0x29   :  { %v1369_v37 = vsel %vm69_vm0, %v1360_v35, -1e+30  ;;  %v1374_v38 = vsel %vm69_vm0, %v1362_v36, -1e+30  ;;  %1968 = vst [vmem:[#allocation11_spill] sm:$0xff] %v1376_v39  ;;  %v1378_v40 = vld [vmem:[#allocation4 + $0x98] sm:$0xff] }
  0x2a   :  { %110 = vmax.xlane.f32.xlu0 %v1273_v13  ;;  %112 = vmax.xlane.f32.xlu1 %v1278_v14  ;;  %v1385_v41 = vsel %vm69_vm0, %v1376_v39, -1e+30  ;;  %v1390_v42 = vsel %vm69_vm0, %v1378_v40, -1e+30  ;;  %v1392_v43 = vld [vmem:[#allocation4 + $0xa0] sm:$0xff]  ;;  %v1394_v44 = vld [vmem:[#allocation4 + $0xa8] sm:$0xff] }
  0x2b   :  { %1969 = vst [vmem:[#allocation12_spill] sm:$0xff] %v1392_v43  ;;  %1970 = vst [vmem:[#allocation13_spill] sm:$0xff] %v1394_v44  ;;  %v1401_v45 = vsel %vm69_vm0, %v1392_v43, -1e+30  ;;  %v1406_v46 = vsel %vm69_vm0, %v1394_v44, -1e+30 }
  0x2c   :  { %v1408_v47 = vld [vmem:[#allocation4 + $0xb0] sm:$0xff]  ;;  %v1410_v48 = vld [vmem:[#allocation4 + $0xb8] sm:$0xff]  ;;  %v1424_v51 = vld [vmem:[#allocation4 + $0xc0] sm:$0xff] }
  0x2d   :  { %1971 = vst [vmem:[#allocation14_spill] sm:$0xff] %v1408_v47  ;;  %1972 = vst [vmem:[#allocation15_spill] sm:$0xff] %v1410_v48  ;;  %v1417_v49 = vsel %vm69_vm0, %v1408_v47, -1e+30  ;;  %v1422_v50 = vsel %vm69_vm0, %v1410_v48, -1e+30 }
  0x2e   :  { %114 = vmax.xlane.f32.xlu0 %v1289_v17  ;;  %116 = vmax.xlane.f32.xlu1 %v1294_v18  ;;  %1973 = vst [vmem:[#allocation16_spill] sm:$0xff] %v1424_v51  ;;  %v1426_v52 = vld [vmem:[#allocation4 + $0xc8] sm:$0xff]  ;;  %v1433_v53 = vsel %vm69_vm0, %v1424_v51, -1e+30  ;;  %v1440_v55 = vld [vmem:[#allocation4 + $0xd0] sm:$0xff]  ;;  %v1442_v56 = vld [vmem:[#allocation4 + $0xd8] sm:$0xff] }
  0x2f   :  { %1974 = vst [vmem:[#allocation17_spill] sm:$0xff] %v1426_v52  ;;  %v1438_v54 = vsel %vm69_vm0, %v1426_v52, -1e+30  ;;  %1975 = vst [vmem:[#allocation18_spill] sm:$0xff] %v1440_v55  ;;  %v1449_v57 = vsel %vm69_vm0, %v1440_v55, -1e+30 }
  0x30   :  { %1976 = vst [vmem:[#allocation19_spill] sm:$0xff] %v1442_v56  ;;  %v1454_v58 = vsel %vm69_vm0, %v1442_v56, -1e+30  ;;  %v1456_v59 = vld [vmem:[#allocation4 + $0xe0] sm:$0xff]  ;;  %v1458_v60 = vld [vmem:[#allocation4 + $0xe8] sm:$0xff]  ;;  %v1472_v63 = vld [vmem:[#allocation4 + $0xf0] sm:$0xff] }
  0x31   :  { %1977 = vst [vmem:[#allocation20_spill] sm:$0xff] %v1456_v59  ;;  %1978 = vst [vmem:[#allocation21_spill] sm:$0xff] %v1458_v60  ;;  %v1465_v61 = vsel %vm69_vm0, %v1456_v59, -1e+30  ;;  %v1470_v62 = vsel %vm69_vm0, %v1458_v60, -1e+30 }
  0x32   :  { %118 = vmax.xlane.f32.xlu0 %v1305_v21  ;;  %120 = vmax.xlane.f32.xlu1 %v1310_v22  ;;  %1979 = vst [vmem:[#allocation22_spill] sm:$0xff] %v1472_v63  ;;  %v1474_v0 = vld [vmem:[#allocation4 + $0xf8] sm:$0xff]  ;;  %v1481_v1 = vsel %vm69_vm0, %v1472_v63, -1e+30  ;;  %v1195_v60 = vmov 0  }
  0x33   :  { %1980 = vst [vmem:[#allocation23_spill] sm:$0xff] %v1474_v0  ;;  %v1486_v59 = vsel %vm69_vm0, %v1474_v0, -1e+30  ;;  %995 = vset.pattern.permute.xlu1 %v1195_v60  ;;  %994 = vset.pattern.permute.xlu0 %v1195_v60 }
  0x36   :  { %122 = vmax.xlane.f32.xlu0 %v1321_v25  ;;  %124 = vmax.xlane.f32.xlu1 %v1326_v26 }
  0x3a   :  { %126 = vmax.xlane.f32.xlu0 %v1337_v29  ;;  %128 = vmax.xlane.f32.xlu1 %v1342_v30 }
  0x3e   :  { %130 = vmax.xlane.f32.xlu0 %v1353_v33  ;;  %132 = vmax.xlane.f32.xlu1 %v1358_v34 }
  0x42   :  { %134 = vmax.xlane.f32.xlu0 %v1369_v37  ;;  %136 = vmax.xlane.f32.xlu1 %v1374_v38 }
  0x46   :  { %138 = vmax.xlane.f32.xlu0 %v1385_v41  ;;  %140 = vmax.xlane.f32.xlu1 %v1390_v42 }
  0x4a   :  { %142 = vmax.xlane.f32.xlu0 %v1401_v45  ;;  %144 = vmax.xlane.f32.xlu1 %v1406_v46 }
  0x4e   :  { %146 = vmax.xlane.f32.xlu0 %v1417_v49  ;;  %148 = vmax.xlane.f32.xlu1 %v1422_v50 }
  0x52   :  { %150 = vmax.xlane.f32.xlu0 %v1433_v53  ;;  %152 = vmax.xlane.f32.xlu1 %v1438_v54 }
  0x56   :  { %154 = vmax.xlane.f32.xlu0 %v1449_v57  ;;  %156 = vmax.xlane.f32.xlu1 %v1454_v58 }
  0x5a   :  { %158 = vmax.xlane.f32.xlu0 %v1465_v61  ;;  %160 = vmax.xlane.f32.xlu1 %v1470_v62 }
  0x5e   :  { %162 = vmax.xlane.f32.xlu0 %v1481_v1  ;;  %164 = vmax.xlane.f32.xlu1 %v1486_v59 }
  0xaf   :  { %v1490_v55 = vpop.xlane.xlu0 %102  ;;  %v1492_v56 = vpop.xlane.xlu1 %106 }
  0xb0   :  { %1981 = vst [vmem:[#allocation24_spill] sm:$0xff] %v1490_v55  ;;  %v166_v63 = vsub.f32 %v1245_v7, %v1490_v55  ;;  %v168_v51 = vsub.f32 %v1250_v8, %v1492_v56 }
  0xb2   :  { %v198_v52 = vmul.f32 1.442695, %v166_v63  ;;  %v202_v0 = vmul.f32 1.442695, %v168_v51 }
  0xb3   :  { %v1498_v47 = vpop.xlane.xlu0 %104  ;;  %v1500_v48 = vpop.xlane.xlu1 %108 }
  0xb4   :  { %996 = vpow2.f32 %v198_v52  ;;  %v167_v60 = vsub.f32 %v1257_v9, %v1498_v47  ;;  %v169_v43 = vsub.f32 %v1262_v10, %v1500_v48 }
  0xb5   :  { %998 = vpow2.f32 %v202_v0 }
  0xb6   :  { %v200_v44 = vmul.f32 1.442695, %v167_v60  ;;  %v204_v39 = vmul.f32 1.442695, %v169_v43 }
  0xb7   :  { %v1506_v7 = vpop.xlane.xlu0 %110  ;;  %v1508_v55 = vpop.xlane.xlu1 %112 }
  0xb8   :  { %1000 = vpow2.f32 %v200_v44  ;;  %v170_v8 = vsub.f32 %v1273_v13, %v1506_v7  ;;  %v171_v51 = vsub.f32 %v1278_v14, %v1508_v55 }
  0xb9   :  { %1002 = vpow2.f32 %v204_v39 }
  0xba   :  { %v206_v52 = vmul.f32 1.442695, %v170_v8  ;;  %v208_v9 = vmul.f32 1.442695, %v171_v51 }
  0xbb   :  { %v1514_v63 = vpop.xlane.xlu0 %114  ;;  %v1516_v10 = vpop.xlane.xlu1 %116 }
  0xbc   :  { %1982 = vst [vmem:[#allocation25_spill] sm:$0xff] %v1516_v10  ;;  %1004 = vpow2.f32 %v206_v52  ;;  %v172_v43 = vsub.f32 %v1289_v17, %v1514_v63  ;;  %v173_v44 = vsub.f32 %v1294_v18, %v1516_v10 }
  0xbd   :  { %1006 = vpow2.f32 %v208_v9 }
  0xbe   :  { %v997_v0 = vpop.eup %996  ;;  %v210_v13 = vmul.f32 1.442695, %v172_v43  ;;  %v212_v60 = vmul.f32 1.442695, %v173_v44 }
  0xbf   :  { %262 = vadd.xlane.f32.xlu0 %v997_v0  ;;  %v1522_v14 = vpop.xlane.xlu0 %118  ;;  %v1524_v39 = vpop.xlane.xlu1 %120 }
  0xc0   :  { %v999_v8 = vpop.eup %998  ;;  %1008 = vpow2.f32 %v210_v13  ;;  %v174_v51 = vsub.f32 %v1305_v21, %v1522_v14  ;;  %v175_v17 = vsub.f32 %v1310_v22, %v1524_v39 }
  0xc1   :  { %1010 = vpow2.f32 %v212_v60 }
  0xc2   :  { %v1001_v52 = vpop.eup %1000  ;;  %v214_v18 = vmul.f32 1.442695, %v174_v51  ;;  %v216_v10 = vmul.f32 1.442695, %v175_v17 }
  0xc3   :  { %266 = vadd.xlane.f32.xlu0 %v999_v8  ;;  %264 = vadd.xlane.f32.xlu1 %v1001_v52  ;;  %v1530_v9 = vpop.xlane.xlu0 %122  ;;  %v1532_v43 = vpop.xlane.xlu1 %124 }
  0xc4   :  { %v1003_v44 = vpop.eup %1002  ;;  %1012 = vpow2.f32 %v214_v18  ;;  %v176_v0 = vsub.f32 %v1321_v25, %v1530_v9  ;;  %v177_v21 = vsub.f32 %v1326_v26, %v1532_v43 }
  0xc5   :  { %1014 = vpow2.f32 %v216_v10 }
  0xc6   :  { %v1005_v13 = vpop.eup %1004  ;;  %v218_v22 = vmul.f32 1.442695, %v176_v0  ;;  %v220_v60 = vmul.f32 1.442695, %v177_v21 }
  0xc7   :  { %268 = vadd.xlane.f32.xlu1 %v1003_v44  ;;  %270 = vadd.xlane.f32.xlu0 %v1005_v13  ;;  %v1538_v8 = vpop.xlane.xlu0 %126  ;;  %v1540_v51 = vpop.xlane.xlu1 %128 }
  0xc8   :  { %v1007_v17 = vpop.eup %1006  ;;  %1016 = vpow2.f32 %v218_v22  ;;  %v178_v52 = vsub.f32 %v1337_v29, %v1538_v8  ;;  %v179_v25 = vsub.f32 %v1342_v30, %v1540_v51 }
  0xc9   :  { %1018 = vpow2.f32 %v220_v60 }
  0xca   :  { %v1009_v18 = vpop.eup %1008  ;;  %v222_v26 = vmul.f32 1.442695, %v178_v52  ;;  %v224_v10 = vmul.f32 1.442695, %v179_v25 }
  0xcb   :  { %272 = vadd.xlane.f32.xlu1 %v1007_v17  ;;  %274 = vadd.xlane.f32.xlu0 %v1009_v18  ;;  %v1546_v44 = vpop.xlane.xlu0 %130  ;;  %v1548_v0 = vpop.xlane.xlu1 %132 }
  0xcc   :  { %1983 = vst [vmem:[#allocation26_spill] sm:$0xff] %v1546_v44  ;;  %1984 = vst [vmem:[#allocation27_spill] sm:$0xff] %v1548_v0  ;;  %v1011_v21 = vpop.eup %1010  ;;  %1020 = vpow2.f32 %v222_v26  ;;  %v180_v13 = vsub.f32 %v1353_v33, %v1546_v44  ;;  %v181_v29 = vsub.f32 %v1358_v34, %v1548_v0 }
  0xcd   :  { %1022 = vpow2.f32 %v224_v10 }
  0xce   :  { %v1013_v22 = vpop.eup %1012  ;;  %v226_v30 = vmul.f32 1.442695, %v180_v13  ;;  %v228_v60 = vmul.f32 1.442695, %v181_v29 }
  0xcf   :  { %276 = vadd.xlane.f32.xlu1 %v1011_v21  ;;  %278 = vadd.xlane.f32.xlu0 %v1013_v22  ;;  %v1554_v17 = vpop.xlane.xlu0 %134  ;;  %v1556_v52 = vpop.xlane.xlu1 %136 }
  0xd0   :  { %1985 = vst [vmem:[#allocation28_spill] sm:$0xff] %v1554_v17  ;;  %1986 = vst [vmem:[#allocation29_spill] sm:$0xff] %v1556_v52  ;;  %v1015_v25 = vpop.eup %1014  ;;  %1024 = vpow2.f32 %v226_v30  ;;  %v182_v18 = vsub.f32 %v1369_v37, %v1554_v17  ;;  %v183_v33 = vsub.f32 %v1374_v38, %v1556_v52 }
  0xd1   :  { %1026 = vpow2.f32 %v228_v60 }
  0xd2   :  { %v1017_v26 = vpop.eup %1016  ;;  %v230_v34 = vmul.f32 1.442695, %v182_v18  ;;  %v232_v10 = vmul.f32 1.442695, %v183_v33 }
  0xd3   :  { %280 = vadd.xlane.f32.xlu1 %v1015_v25  ;;  %282 = vadd.xlane.f32.xlu0 %v1017_v26  ;;  %v1562_v21 = vpop.xlane.xlu0 %138  ;;  %v1564_v13 = vpop.xlane.xlu1 %140 }
  0xd4   :  { %1987 = vst [vmem:[#allocation30_spill] sm:$0xff] %v1562_v21  ;;  %1988 = vst [vmem:[#allocation31_spill] sm:$0xff] %v1564_v13  ;;  %v1019_v29 = vpop.eup %1018  ;;  %1028 = vpow2.f32 %v230_v34  ;;  %v184_v22 = vsub.f32 %v1385_v41, %v1562_v21  ;;  %v185_v37 = vsub.f32 %v1390_v42, %v1564_v13 }
  0xd5   :  { %1030 = vpow2.f32 %v232_v10 }
  0xd6   :  { %v1021_v30 = vpop.eup %1020  ;;  %v234_v38 = vmul.f32 1.442695, %v184_v22  ;;  %v236_v60 = vmul.f32 1.442695, %v185_v37 }
  0xd7   :  { %284 = vadd.xlane.f32.xlu1 %v1019_v29  ;;  %286 = vadd.xlane.f32.xlu0 %v1021_v30  ;;  %v1570_v25 = vpop.xlane.xlu0 %142  ;;  %v1572_v18 = vpop.xlane.xlu1 %144 }
  0xd8   :  { %1989 = vst [vmem:[#allocation32_spill] sm:$0xff] %v1570_v25  ;;  %1990 = vst [vmem:[#allocation33_spill] sm:$0xff] %v1572_v18  ;;  %v1023_v33 = vpop.eup %1022  ;;  %1032 = vpow2.f32 %v234_v38  ;;  %v186_v26 = vsub.f32 %v1401_v45, %v1570_v25  ;;  %v187_v41 = vsub.f32 %v1406_v46, %v1572_v18 }
  0xd9   :  { %1034 = vpow2.f32 %v236_v60 }
  0xda   :  { %v1025_v34 = vpop.eup %1024  ;;  %v238_v42 = vmul.f32 1.442695, %v186_v26  ;;  %v240_v10 = vmul.f32 1.442695, %v187_v41 }
  0xdb   :  { %288 = vadd.xlane.f32.xlu1 %v1023_v33  ;;  %290 = vadd.xlane.f32.xlu0 %v1025_v34  ;;  %v1578_v29 = vpop.xlane.xlu0 %146  ;;  %v1580_v22 = vpop.xlane.xlu1 %148 }
  0xdc   :  { %1991 = vst [vmem:[#allocation34_spill] sm:$0xff] %v1578_v29  ;;  %1992 = vst [vmem:[#allocation35_spill] sm:$0xff] %v1580_v22  ;;  %v1027_v37 = vpop.eup %1026  ;;  %1036 = vpow2.f32 %v238_v42  ;;  %v188_v30 = vsub.f32 %v1417_v49, %v1578_v29  ;;  %v189_v45 = vsub.f32 %v1422_v50, %v1580_v22 }
  0xdd   :  { %1038 = vpow2.f32 %v240_v10 }
  0xde   :  { %v1029_v38 = vpop.eup %1028  ;;  %v242_v46 = vmul.f32 1.442695, %v188_v30  ;;  %v244_v60 = vmul.f32 1.442695, %v189_v45 }
  0xdf   :  { %292 = vadd.xlane.f32.xlu1 %v1027_v37  ;;  %294 = vadd.xlane.f32.xlu0 %v1029_v38  ;;  %v1586_v33 = vpop.xlane.xlu0 %150  ;;  %v1588_v26 = vpop.xlane.xlu1 %152 }
  0xe0   :  { %1993 = vst [vmem:[#allocation36_spill] sm:$0xff] %v1586_v33  ;;  %1994 = vst [vmem:[#allocation37_spill] sm:$0xff] %v1588_v26  ;;  %v1031_v41 = vpop.eup %1030  ;;  %1040 = vpow2.f32 %v242_v46  ;;  %v190_v34 = vsub.f32 %v1433_v53, %v1586_v33  ;;  %v191_v49 = vsub.f32 %v1438_v54, %v1588_v26 }
  0xe1   :  { %1042 = vpow2.f32 %v244_v60 }
  0xe2   :  { %v1033_v42 = vpop.eup %1032  ;;  %v246_v50 = vmul.f32 1.442695, %v190_v34  ;;  %v248_v10 = vmul.f32 1.442695, %v191_v49 }
  0xe3   :  { %296 = vadd.xlane.f32.xlu1 %v1031_v41  ;;  %298 = vadd.xlane.f32.xlu0 %v1033_v42  ;;  %v1594_v37 = vpop.xlane.xlu0 %154  ;;  %v1596_v30 = vpop.xlane.xlu1 %156 }
  0xe4   :  { %1995 = vst [vmem:[#allocation38_spill] sm:$0xff] %v1594_v37  ;;  %1996 = vst [vmem:[#allocation39_spill] sm:$0xff] %v1596_v30  ;;  %v1035_v45 = vpop.eup %1034  ;;  %1044 = vpow2.f32 %v246_v50  ;;  %v192_v38 = vsub.f32 %v1449_v57, %v1594_v37  ;;  %v193_v53 = vsub.f32 %v1454_v58, %v1596_v30 }
  0xe5   :  { %1046 = vpow2.f32 %v248_v10 }
  0xe6   :  { %v1037_v46 = vpop.eup %1036  ;;  %v250_v54 = vmul.f32 1.442695, %v192_v38  ;;  %v252_v60 = vmul.f32 1.442695, %v193_v53 }
  0xe7   :  { %300 = vadd.xlane.f32.xlu1 %v1035_v45  ;;  %302 = vadd.xlane.f32.xlu0 %v1037_v46  ;;  %v1602_v41 = vpop.xlane.xlu0 %158  ;;  %v1604_v34 = vpop.xlane.xlu1 %160 }
  0xe8   :  { %1997 = vst [vmem:[#allocation40_spill] sm:$0xff] %v1602_v41  ;;  %1998 = vst [vmem:[#allocation41_spill] sm:$0xff] %v1604_v34  ;;  %v1039_v49 = vpop.eup %1038  ;;  %1048 = vpow2.f32 %v250_v54  ;;  %v194_v42 = vsub.f32 %v1465_v61, %v1602_v41  ;;  %v195_v57 = vsub.f32 %v1470_v62, %v1604_v34 }
  0xe9   :  { %1050 = vpow2.f32 %v252_v60 }
  0xea   :  { %v1041_v50 = vpop.eup %1040  ;;  %v254_v58 = vmul.f32 1.442695, %v194_v42  ;;  %v256_v10 = vmul.f32 1.442695, %v195_v57 }
  0xeb   :  { %304 = vadd.xlane.f32.xlu1 %v1039_v49  ;;  %306 = vadd.xlane.f32.xlu0 %v1041_v50  ;;  %v1610_v45 = vpop.xlane.xlu0 %162  ;;  %v1043_v38 = vpop.eup %1042  ;;  %v424_v50 = vld [vmem:[%s1931_s1 + $0x10] sm:$0xff] }
  0xec   :  { %1999 = vst [vmem:[#allocation42_spill] sm:$0xff] %v1610_v45  ;;  %1052 = vpow2.f32 %v254_v58  ;;  %v196_v53 = vsub.f32 %v1481_v1, %v1610_v45  ;;  %v423_v1 = vld [vmem:[%s1931_s1 + $0x8] sm:$0xff]  ;;  %v422_v58 = vld [vmem:[%s1931_s1] sm:$0xff] }
  0xed   :  { %1054 = vpow2.f32 %v256_v10  ;;  %v425_v10 = vld [vmem:[%s1931_s1 + $0x18] sm:$0xff] }
  0xee   :  { %v1045_v46 = vpop.eup %1044  ;;  %v258_v54 = vmul.f32 1.442695, %v196_v53  ;;  %v426_v53 = vld [vmem:[%s1931_s1 + $0x20] sm:$0xff] }
  0xef   :  { %308 = vadd.xlane.f32.xlu1 %v1043_v38  ;;  %310 = vadd.xlane.f32.xlu0 %v1045_v46  ;;  %v1047_v61 = vpop.eup %1046  ;;  %v431_v38 = vld [vmem:[%s1931_s1 + $0x48] sm:$0xff]  ;;  %v433_v46 = vld [vmem:[%s1931_s1 + $0x58] sm:$0xff] }
  0xf0   :  { %1056 = vpow2.f32 %v258_v54  ;;  %v427_v54 = vld [vmem:[%s1931_s1 + $0x28] sm:$0xff] }
  0xf2   :  { %v1049_v62 = vpop.eup %1048 }
  0xf3   :  { %312 = vadd.xlane.f32.xlu1 %v1047_v61  ;;  %314 = vadd.xlane.f32.xlu0 %v1049_v62  ;;  %v1051_v60 = vpop.eup %1050  ;;  %v435_v61 = vld [vmem:[%s1931_s1 + $0x68] sm:$0xff]  ;;  %v428_v62 = vld [vmem:[%s1931_s1 + $0x30] sm:$0xff] }
  0xf6   :  { %v1053_v49 = vpop.eup %1052 }
  0xf7   :  { %316 = vadd.xlane.f32.xlu1 %v1051_v60  ;;  %318 = vadd.xlane.f32.xlu0 %v1053_v49  ;;  %v1055_v42 = vpop.eup %1054  ;;  %v437_v60 = vld [vmem:[%s1931_s1 + $0x78] sm:$0xff]  ;;  %v439_v49 = vld [vmem:[%s1931_s1 + $0x88] sm:$0xff] }
  0xfa   :  { %v1057_v57 = vpop.eup %1056 }
  0xfb   :  { %320 = vadd.xlane.f32.xlu1 %v1055_v42  ;;  %322 = vadd.xlane.f32.xlu0 %v1057_v57  ;;  %v441_v42 = vld [vmem:[%s1931_s1 + $0x98] sm:$0xff]  ;;  %v443_v57 = vld [vmem:[%s1931_s1 + $0xa8] sm:$0xff] }
 0x10c   :  { %458 = vperm.xlu1 %995, %v423_v1   ;;  %v1656_v1 = vpop.xlane.xlu1 %164 }
 0x10d   :  { %2000 = vst [vmem:[#allocation43_spill] sm:$0xff] %v1656_v1 }
 0x110   :  { %461 = vperm.xlu1 %995, %v424_v50   ;;  %v445_v50 = vld [vmem:[%s1931_s1 + $0xb8] sm:$0xff] }
 0x111   :  { %455 = vperm.xlu0 %994, %v422_v58   ;;  %v197_v58 = vsub.f32 %v1486_v59, %v1656_v1  ;;  %v453_v59 = vld [vmem:[%s1931_s1 + $0xf8] sm:$0xff] }
 0x114   :  { %464 = vperm.xlu1 %995, %v425_v10   ;;  %v447_v10 = vld [vmem:[%s1931_s1 + $0xc8] sm:$0xff] }
 0x115   :  { %482 = vperm.xlu0 %994, %v431_v38   ;;  %v260_v38 = vmul.f32 1.442695, %v197_v58 }
 0x117   :  { %1058 = vpow2.f32 %v260_v38  ;;  %v432_v38 = vld [vmem:[%s1931_s1 + $0x50] sm:$0xff] }
 0x118   :  { %467 = vperm.xlu1 %995, %v426_v53   ;;  %v449_v53 = vld [vmem:[%s1931_s1 + $0xd8] sm:$0xff] }
 0x119   :  { %488 = vperm.xlu0 %994, %v433_v46   ;;  %v451_v46 = vld [vmem:[%s1931_s1 + $0xe8] sm:$0xff] }
 0x11c   :  { %470 = vperm.xlu1 %995, %v427_v54  }
 0x11d   :  { %494 = vperm.xlu0 %994, %v435_v61  }
 0x120   :  { %473 = vperm.xlu1 %995, %v428_v62  }
 0x121   :  { %500 = vperm.xlu0 %994, %v437_v60   ;;  %v1059_v54 = vpop.eup %1058 }
 0x125   :  { %506 = vperm.xlu0 %994, %v439_v49   ;;  %v429_v49 = vld [vmem:[%s1931_s1 + $0x38] sm:$0xff] }
 0x129   :  { %512 = vperm.xlu0 %994, %v441_v42  }
 0x12d   :  { %518 = vperm.xlu0 %994, %v443_v57  }
 0x131   :  { %524 = vperm.xlu0 %994, %v445_v50   ;;  %v430_v50 = vld [vmem:[%s1931_s1 + $0x40] sm:$0xff] }
 0x135   :  { %530 = vperm.xlu0 %994, %v447_v10  }
 0x139   :  { %536 = vperm.xlu0 %994, %v449_v53  }
 0x13d   :  { %542 = vperm.xlu0 %994, %v451_v46  }
 0x141   :  { %548 = vperm.xlu0 %994, %v453_v59   ;;  %v434_v59 = vld [vmem:[%s1931_s1 + $0x60] sm:$0xff] }
 0x144   :  { %324 = vadd.xlane.f32.xlu1 %v1059_v54 }
 0x14c   :  { %v1675_v61 = vpop.xlane.xlu0 %262 }
 0x150   :  { %v1677_v62 = vpop.xlane.xlu1 %264  ;;  %v1679_v60 = vpop.xlane.xlu0 %266 }
 0x154   :  { %v1684_v42 = vpop.xlane.xlu1 %268  ;;  %v1686_v57 = vpop.xlane.xlu0 %270 }
 0x155   :  { %476 = vperm.xlu1 %995, %v429_v49  }
 0x158   :  { %v1691_v58 = vpop.xlane.xlu1 %272  ;;  %v1693_v10 = vpop.xlane.xlu0 %274 }
 0x159   :  { %479 = vperm.xlu1 %995, %v430_v50   ;;  %v436_v50 = vld [vmem:[%s1931_s1 + $0x70] sm:$0xff] }
 0x15c   :  { %v1698_v53 = vpop.xlane.xlu1 %276  ;;  %v1700_v46 = vpop.xlane.xlu0 %278 }
 0x15d   :  { %485 = vperm.xlu1 %995, %v432_v38   ;;  %v438_v38 = vld [vmem:[%s1931_s1 + $0x80] sm:$0xff] }
 0x160   :  { %v1705_v54 = vpop.xlane.xlu1 %280  ;;  %v1707_v49 = vpop.xlane.xlu0 %282 }
 0x161   :  { %491 = vperm.xlu1 %995, %v434_v59   ;;  %v440_v59 = vld [vmem:[%s1931_s1 + $0x90] sm:$0xff] }
 0x164   :  { %v1712_v45 = vpop.xlane.xlu1 %284  ;;  %v1717_v1 = vpop.xlane.xlu0 %286 }
 0x165   :  { %497 = vperm.xlu1 %995, %v436_v50   ;;  %v442_v50 = vld [vmem:[%s1931_s1 + $0xa0] sm:$0xff] }
 0x168   :  { %v1719_v34 = vpop.xlane.xlu1 %288  ;;  %v1726_v30 = vpop.xlane.xlu0 %290 }
 0x169   :  { %503 = vperm.xlu1 %995, %v438_v38   ;;  %v444_v38 = vld [vmem:[%s1931_s1 + $0xb0] sm:$0xff] }
 0x16c   :  { %v1724_v41 = vpop.xlane.xlu1 %292  ;;  %v1736_v26 = vpop.xlane.xlu0 %294 }
 0x16d   :  { %509 = vperm.xlu1 %995, %v440_v59   ;;  %v446_v59 = vld [vmem:[%s1931_s1 + $0xc0] sm:$0xff] }
 0x170   :  { %v1731_v37 = vpop.xlane.xlu1 %296  ;;  %v1745_v29 = vpop.xlane.xlu0 %298 }
 0x171   :  { %515 = vperm.xlu1 %995, %v442_v50   ;;  %v448_v50 = vld [vmem:[%s1931_s1 + $0xd0] sm:$0xff] }
 0x174   :  { %v1738_v33 = vpop.xlane.xlu1 %300  ;;  %v1755_v25 = vpop.xlane.xlu0 %302 }
 0x175   :  { %521 = vperm.xlu1 %995, %v444_v38   ;;  %v450_v38 = vld [vmem:[%s1931_s1 + $0xe0] sm:$0xff] }
 0x178   :  { %v1743_v22 = vpop.xlane.xlu1 %304  ;;  %v1764_v52 = vpop.xlane.xlu0 %306 }
 0x179   :  { %527 = vperm.xlu1 %995, %v446_v59   ;;  %v452_v59 = vld [vmem:[%s1931_s1 + $0xf0] sm:$0xff]  ;;  %s1196_s1 = smov [#allocation4]  }
 0x17a   :  { %s948_s6 = sshll.u32 %s1196_s1, 4  ;;  %s949_s6 = int_to_ptr.vmem [resolvable:$true] %s948_s6 }
 0x17b   :  { %s1136_s7 = scalar_lea.vmem %s949_s6, 4096  ;;  %p1141_p7 = scmp.lt.s32.totalorder %s949_s6, %s949_s6 }
 0x17c   :  { %v1750_v18 = vpop.xlane.xlu1 %308  ;;  %p1137_p6 = scmp.ne.s32.totalorder %s949_s6, %s1136_s7  ;;  %p1142_p8 = scmp.lt.s32.totalorder %s1136_s7, %s1136_s7 }
 0x17d   :  { %2001 = vst [vmem:[#allocation44_spill] sm:$0xff] %v1750_v18  ;;  %533 = vperm.xlu1 %995, %v448_v50   ;;  %v1768_v50 = vpop.xlane.xlu0 %310 }
 0x17e   :  { %2005 = vst [vmem:[#allocation48_spill] sm:$0xff] %v1768_v50  ;;  %p1143_p9 = por %p1142_p8, %p1141_p7 }
 0x180   :  { %v1757_v13 = vpop.xlane.xlu1 %312  ;;  %p1144_p10 = pnand %p1143_p9, %p1137_p6 }
 0x181   :  { %2002 = vst [vmem:[#allocation45_spill] sm:$0xff] %v1757_v13  ;;  %539 = vperm.xlu1 %995, %v450_v38   ;;  %v1773_v13 = vpop.xlane.xlu0 %314 }
 0x182   :  { %2006 = vst [vmem:[#allocation49_spill] sm:$0xff] %v1773_v13 }
 0x184   :  { %v1762_v21 = vpop.xlane.xlu1 %316 }
 0x185   :  { %2003 = vst [vmem:[#allocation46_spill] sm:$0xff] %v1762_v21  ;;  %545 = vperm.xlu1 %995, %v452_v59   ;;  %v1776_v18 = vpop.xlane.xlu0 %318 }
 0x188   :  { %v1766_v17 = vpop.xlane.xlu1 %320 }
 0x189   :  { %2004 = vst [vmem:[#allocation47_spill] sm:$0xff] %v1766_v17 }
 0x18c   :  { %v459_v0 = vpop.permute.xlu1 %458 }
 0x18d   :  { %vm551_vm1 = vcmp.eq.s32.totalorder %v1233_v3, %v459_v0 }
 0x18e   :  { %v583_v44 = vsel %vm551_vm1, %v1238_v5, 0.0  ;;  %v1780_v5 = vpop.xlane.xlu0 %322 }
 0x18f   :  { %616 = vadd.xlane.f32.xlu0 %v583_v44  ;;  %2007 = vst [vmem:[#allocation50_spill] sm:$0xff] %v1780_v5 }
 0x190   :  { %v462_v38 = vpop.permute.xlu1 %461 }
 0x191   :  { %vm552_vm2 = vcmp.eq.s32.totalorder %v1233_v3, %v462_v38 }
 0x192   :  { %v584_v21 = vsel %vm552_vm2, %v1235_v4, 0.0  ;;  %v456_v38 = vpop.permute.xlu0 %455 }
 0x193   :  { %618 = vadd.xlane.f32.xlu0 %v584_v21  ;;  %vm550_vm5 = vcmp.eq.s32.totalorder %v1233_v3, %v456_v38 }
 0x194   :  { %v465_v59 = vpop.permute.xlu1 %464  ;;  %v582_v4 = vsel %vm550_vm5, %v1231_v2, 0.0 }
 0x195   :  { %vm553_vm6 = vcmp.eq.s32.totalorder %v1233_v3, %v465_v59 }
 0x196   :  { %v483_v21 = vpop.permute.xlu0 %482 }
 0x197   :  { %vm559_vm9 = vcmp.eq.s32.totalorder %v1233_v3, %v483_v21 }
 0x198   :  { %v468_v17 = vpop.permute.xlu1 %467 }
 0x199   :  { %vm554_vm3 = vcmp.eq.s32.totalorder %v1233_v3, %v468_v17 }
 0x19a   :  { %v586_v50 = vsel %vm554_vm3, %v1264_v11, 0.0  ;;  %v585_v11 = vsel %vm553_vm6, %v1240_v6, 0.0 }
 0x19b   :  { %622 = vadd.xlane.f32.xlu0 %v586_v50  ;;  %v489_v50 = vpop.permute.xlu0 %488 }
 0x19c   :  { %v471_v0 = vpop.permute.xlu1 %470  ;;  %vm561_vm11 = vcmp.eq.s32.totalorder %v1233_v3, %v489_v50 }
 0x19d   :  { %vm555_vm7 = vcmp.eq.s32.totalorder %v1233_v3, %v471_v0 }
 0x19e   :  { %v587_v17 = vsel %vm555_vm7, %v1266_v12, 0.0  ;;  %v591_v12 = vsel %vm559_vm9, %v1298_v20, 0.0 }
 0x1a0   :  { %v474_v44 = vpop.permute.xlu1 %473 }
 0x1a1   :  { %vm556_vm4 = vcmp.eq.s32.totalorder %v1233_v3, %v474_v44  ;;  %v495_v44 = vpop.permute.xlu0 %494 }
 0x1a2   :  { %v588_v13 = vsel %vm556_vm4, %v1280_v15, 0.0  ;;  %vm563_vm13 = vcmp.eq.s32.totalorder %v1233_v3, %v495_v44 }
 0x1a3   :  { %626 = vadd.xlane.f32.xlu0 %v588_v13 }
 0x1a5   :  { %v501_v15 = vpop.permute.xlu0 %500 }
 0x1a6   :  { %vm565_vm15 = vcmp.eq.s32.totalorder %v1233_v3, %v501_v15 }
 0x1a9   :  { %614 = vadd.xlane.f32.xlu1 %v582_v4  ;;  %v507_v2 = vpop.permute.xlu0 %506 }
 0x1aa   :  { %vm567_vm1 = vcmp.eq.s32.totalorder %v1233_v3, %v507_v2  ;;  %v2008_v2 = vld [vmem:[#allocation11_spill] sm:$0xff] }
 0x1ad   :  { %620 = vadd.xlane.f32.xlu1 %v585_v11  ;;  %v513_v38 = vpop.permute.xlu0 %512 }
 0x1ae   :  { %vm569_vm3 = vcmp.eq.s32.totalorder %v1233_v3, %v513_v38 }
 0x1b1   :  { %624 = vadd.xlane.f32.xlu1 %v587_v17  ;;  %v519_v20 = vpop.permute.xlu0 %518 }
 0x1b2   :  { %vm571_vm5 = vcmp.eq.s32.totalorder %v1233_v3, %v519_v20  ;;  %v2013_v20 = vld [vmem:[#allocation17_spill] sm:$0xff] }
 0x1b5   :  { %v525_v44 = vpop.permute.xlu0 %524 }
 0x1b6   :  { %vm573_vm7 = vcmp.eq.s32.totalorder %v1233_v3, %v525_v44 }
 0x1d1   :  { %v1790_v5 = vpop.xlane.xlu1 %324 }
 0x1d5   :  { %v477_v13 = vpop.permute.xlu1 %476 }
 0x1d6   :  { %vm557_vm8 = vcmp.eq.s32.totalorder %v1233_v3, %v477_v13 }
 0x1d7   :  { %v589_v59 = vsel %vm557_vm8, %v1282_v16, 0.0  ;;  %v593_v16 = vsel %vm561_vm11, %v1314_v24, 0.0 }
 0x1d8   :  { %628 = vadd.xlane.f32.xlu1 %v589_v59 }
 0x1d9   :  { %v480_v6 = vpop.permute.xlu1 %479 }
 0x1da   :  { %vm558_vm10 = vcmp.eq.s32.totalorder %v1233_v3, %v480_v6 }
 0x1db   :  { %v590_v0 = vsel %vm558_vm10, %v1296_v19, 0.0  ;;  %v595_v19 = vsel %vm563_vm13, %v1330_v28, 0.0 }
 0x1dc   :  { %630 = vadd.xlane.f32.xlu0 %v590_v0  ;;  %632 = vadd.xlane.f32.xlu1 %v591_v12  ;;  %v2010_v12 = vld [vmem:[#allocation12_spill] sm:$0xff] }
 0x1dd   :  { %v486_v4 = vpop.permute.xlu1 %485 }
 0x1de   :  { %vm560_vm12 = vcmp.eq.s32.totalorder %v1233_v3, %v486_v4  ;;  %v2011_v4 = vld [vmem:[#allocation15_spill] sm:$0xff] }
 0x1df   :  { %v592_v11 = vsel %vm560_vm12, %v1312_v23, 0.0  ;;  %v597_v23 = vsel %vm565_vm15, %v1346_v32, 0.0  ;;  %v531_v32 = vpop.permute.xlu0 %530 }
 0x1e0   :  { %634 = vadd.xlane.f32.xlu0 %v592_v11  ;;  %636 = vadd.xlane.f32.xlu1 %v593_v16  ;;  %v605_v16 = vsel %vm573_vm7, %v2011_v4, 0.0  ;;  %v2012_v11 = vld [vmem:[#allocation14_spill] sm:$0xff]  ;;  %vm575_vm9 = vcmp.eq.s32.totalorder %v1233_v3, %v531_v32 }
 0x1e1   :  { %v492_v17 = vpop.permute.xlu1 %491 }
 0x1e2   :  { %vm562_vm14 = vcmp.eq.s32.totalorder %v1233_v3, %v492_v17 }
 0x1e3   :  { %v594_v21 = vsel %vm562_vm14, %v1328_v27, 0.0  ;;  %v599_v27 = vsel %vm567_vm1, %v1362_v36, 0.0  ;;  %v537_v38 = vpop.permute.xlu0 %536 }
 0x1e4   :  { %638 = vadd.xlane.f32.xlu0 %v594_v21  ;;  %640 = vadd.xlane.f32.xlu1 %v595_v19  ;;  %v607_v21 = vsel %vm575_vm9, %v2013_v20, 0.0  ;;  %vm577_vm11 = vcmp.eq.s32.totalorder %v1233_v3, %v537_v38  ;;  %v2020_v38 = vld [vmem:[#allocation22_spill] sm:$0xff] }
 0x1e5   :  { %v498_v50 = vpop.permute.xlu1 %497 }
 0x1e6   :  { %vm564_vm0 = vcmp.eq.s32.totalorder %v1233_v3, %v498_v50 }
 0x1e7   :  { %v596_v24 = vsel %vm564_vm0, %v1344_v31, 0.0  ;;  %v601_v31 = vsel %vm569_vm3, %v1378_v40, 0.0  ;;  %v543_v50 = vpop.permute.xlu0 %542 }
 0x1e8   :  { %642 = vadd.xlane.f32.xlu0 %v596_v24  ;;  %644 = vadd.xlane.f32.xlu1 %v597_v23  ;;  %v2014_v23 = vld [vmem:[#allocation16_spill] sm:$0xff]  ;;  %vm579_vm13 = vcmp.eq.s32.totalorder %v1233_v3, %v543_v50 }
 0x1e9   :  { %v504_v28 = vpop.permute.xlu1 %503 }
 0x1ea   :  { %vm566_vm2 = vcmp.eq.s32.totalorder %v1233_v3, %v504_v28  ;;  %v2015_v28 = vld [vmem:[#allocation19_spill] sm:$0xff] }
 0x1eb   :  { %v598_v15 = vsel %vm566_vm2, %v1360_v35, 0.0  ;;  %v2009_v35 = vld [vmem:[#allocation13_spill] sm:$0xff] }
 0x1ec   :  { %646 = vadd.xlane.f32.xlu0 %v598_v15  ;;  %648 = vadd.xlane.f32.xlu1 %v599_v27  ;;  %v603_v36 = vsel %vm571_vm5, %v2009_v35, 0.0  ;;  %v609_v27 = vsel %vm577_vm11, %v2015_v28, 0.0  ;;  %v2016_v15 = vld [vmem:[#allocation18_spill] sm:$0xff] }
 0x1ed   :  { %v510_v13 = vpop.permute.xlu1 %509 }
 0x1ee   :  { %vm568_vm4 = vcmp.eq.s32.totalorder %v1233_v3, %v510_v13 }
 0x1ef   :  { %v600_v59 = vsel %vm568_vm4, %v2008_v2, 0.0  ;;  %v2017_v2 = vld [vmem:[#allocation21_spill] sm:$0xff] }
 0x1f0   :  { %650 = vadd.xlane.f32.xlu0 %v600_v59  ;;  %652 = vadd.xlane.f32.xlu1 %v601_v31  ;;  %v549_v31 = vpop.permute.xlu0 %548  ;;  %v611_v59 = vsel %vm579_vm13, %v2017_v2, 0.0 }
 0x1f1   :  { %v516_v6 = vpop.permute.xlu1 %515  ;;  %vm581_vm15 = vcmp.eq.s32.totalorder %v1233_v3, %v549_v31 }
 0x1f2   :  { %vm570_vm6 = vcmp.eq.s32.totalorder %v1233_v3, %v516_v6  ;;  %v2018_v6 = vld [vmem:[#allocation20_spill] sm:$0xff] }
 0x1f3   :  { %v602_v0 = vsel %vm570_vm6, %v2010_v12, 0.0  ;;  %v2019_v12 = vld [vmem:[#allocation23_spill] sm:$0xff] }
 0x1f4   :  { %654 = vadd.xlane.f32.xlu0 %v602_v0  ;;  %656 = vadd.xlane.f32.xlu1 %v603_v36  ;;  %v613_v0 = vsel %vm581_vm15, %v2019_v12, 0.0 }
 0x1f5   :  { %v522_v40 = vpop.permute.xlu1 %521 }
 0x1f6   :  { %vm572_vm8 = vcmp.eq.s32.totalorder %v1233_v3, %v522_v40 }
 0x1f7   :  { %v604_v17 = vsel %vm572_vm8, %v2012_v11, 0.0 }
 0x1f8   :  { %658 = vadd.xlane.f32.xlu0 %v604_v17  ;;  %660 = vadd.xlane.f32.xlu1 %v605_v16 }
 0x1f9   :  { %v528_v19 = vpop.permute.xlu1 %527 }
 0x1fa   :  { %vm574_vm10 = vcmp.eq.s32.totalorder %v1233_v3, %v528_v19 }
 0x1fb   :  { %v606_v24 = vsel %vm574_vm10, %v2014_v23, 0.0 }
 0x1fc   :  { %662 = vadd.xlane.f32.xlu0 %v606_v24  ;;  %664 = vadd.xlane.f32.xlu1 %v607_v21 }
 0x1fd   :  { %v534_v44 = vpop.permute.xlu1 %533 }
 0x1fe   :  { %vm576_vm12 = vcmp.eq.s32.totalorder %v1233_v3, %v534_v44 }
 0x1ff   :  { %v608_v13 = vsel %vm576_vm12, %v2016_v15, 0.0 }
 0x200   :  { %666 = vadd.xlane.f32.xlu0 %v608_v13  ;;  %668 = vadd.xlane.f32.xlu1 %v609_v27 }
 0x201   :  { %v540_v32 = vpop.permute.xlu1 %539 }
 0x202   :  { %vm578_vm14 = vcmp.eq.s32.totalorder %v1233_v3, %v540_v32 }
 0x203   :  { %v610_v35 = vsel %vm578_vm14, %v2018_v6, 0.0 }
 0x204   :  { %670 = vadd.xlane.f32.xlu0 %v610_v35  ;;  %672 = vadd.xlane.f32.xlu1 %v611_v59 }
 0x205   :  { %v546_v36 = vpop.permute.xlu1 %545 }
 0x206   :  { %vm580_vm0 = vcmp.eq.s32.totalorder %v1233_v3, %v546_v36 }
 0x207   :  { %v612_v40 = vsel %vm580_vm0, %v2020_v38, 0.0 }
 0x208   :  { %674 = vadd.xlane.f32.xlu0 %v612_v40  ;;  %676 = vadd.xlane.f32.xlu1 %v613_v0 }
 0x209   :  { %1147 = shalt.err (!%p1144_p10)
}
 0x20a   :  { %s1148_s10 = scalar_lea.hbm %s1933_s3, 4096 }
 0x20b   :  { %p1149_p11 = scmp.ne.s32.totalorder %s1933_s3, %s1148_s10  ;;  %p1152_p12 = scmp.lt.u32.totalorder %s1148_s10, %s1933_s3 }
 0x20d   :  { %p1154_p13 = pnand %p1152_p12, %p1149_p11 }
 0x20f   :  { %1157 = shalt.err (!%p1154_p13)
}
 0x210   :  { %s1197_s15 = smov 128   ;;  %s1198_s16 = smov 8   ;;  %1060 = vlog2.f32 %v1679_v60  ;;  %v2021_v24 = vld [vmem:[#allocation24_spill] sm:$0xff]  ;;  %vm941_vm1 = vcmask 0  }
 0x211   :  { %954 = dma.vmem_to_hbm [thread:$0]  %s949_s6, 4096, %s1933_s3, [#allocation5], %s1197_s15, %s1197_s15, %s1198_s16   ;;  %1062 = vlog2.f32 %v1675_v61 }
 0x212   :  { %1064 = vlog2.f32 %v1677_v62  ;;  %s1199_s3 = smov [#allocation6]  }
 0x213   :  { %1066 = vlog2.f32 %v1684_v42  ;;  %s961_s19 = sshll.u32 %s1199_s3, 4  ;;  %s962_s19 = int_to_ptr.vmem [resolvable:$true] %s961_s19 }
 0x214   :  { %1068 = vlog2.f32 %v1686_v57  ;;  %s1158_s20 = scalar_lea.vmem %s962_s19, 16  ;;  %s1162_s0 = scalar_lea.vmem %s962_s19, 32 }
 0x215   :  { %1070 = vlog2.f32 %v1691_v58  ;;  %p1159_p0 = scmp.ne.s32.totalorder %s962_s19, %s1158_s20  ;;  %p1163_p1 = scmp.lt.s32.totalorder %s962_s19, %s962_s19 }
 0x216   :  { %1072 = vlog2.f32 %v1693_v10  ;;  %p1164_p2 = scmp.lt.s32.totalorder %s1162_s0, %s1158_s20 }
 0x217   :  { %1074 = vlog2.f32 %v1698_v53 }
 0x218   :  { %1076 = vlog2.f32 %v1700_v46  ;;  %p1165_p3 = por %p1164_p2, %p1163_p1 }
 0x219   :  { %1078 = vlog2.f32 %v1705_v54  ;;  %v2022_v54 = vld [vmem:[#allocation25_spill] sm:$0xff] }
 0x21a   :  { %v1061_v3 = vpop.eup %1060  ;;  %1080 = vlog2.f32 %v1707_v49  ;;  %p1166_p4 = pnand %p1165_p3, %p1159_p0 }
 0x21b   :  { %v1063_v16 = vpop.eup %1062  ;;  %v331_v17 = vmul.f32 0.6931472, %v1061_v3  ;;  %1082 = vlog2.f32 %v1712_v45 }
 0x21c   :  { %v617_v4 = vpop.xlane.xlu0 %616  ;;  %v1065_v11 = vpop.eup %1064  ;;  %v327_v60 = vmul.f32 0.6931472, %v1063_v16  ;;  %1084 = vlog2.f32 %v1717_v1 }
 0x21d   :  { %v1067_v19 = vpop.eup %1066  ;;  %v329_v21 = vmul.f32 0.6931472, %v1065_v11  ;;  %v392_v62 = vadd.f32 %v331_v17, %v1492_v56  ;;  %1086 = vlog2.f32 %v1719_v34 }
 0x21e   :  { %v1069_v20 = vpop.eup %1068  ;;  %v333_v42 = vmul.f32 0.6931472, %v1067_v19  ;;  %v390_v44 = vadd.f32 %v327_v60, %v2021_v24  ;;  %1088 = vlog2.f32 %v1726_v30 }
 0x21f   :  { %v335_v50 = vmul.f32 0.6931472, %v1069_v20  ;;  %v1071_v23 = vpop.eup %1070  ;;  %v391_v57 = vadd.f32 %v329_v21, %v1498_v47  ;;  %1090 = vlog2.f32 %v1724_v41 }
 0x220   :  { %v619_v61 = vpop.xlane.xlu0 %618  ;;  %v1073_v10 = vpop.eup %1072  ;;  %v393_v32 = vadd.f32 %v333_v42, %v1500_v48  ;;  %v337_v2 = vmul.f32 0.6931472, %v1071_v23  ;;  %1092 = vlog2.f32 %v1736_v26 }
 0x221   :  { %v680_v58 = vsub.f32 %v392_v62, %v619_v61  ;;  %v679_v27 = vsub.f32 %v391_v57, %v617_v4  ;;  %v394_v13 = vadd.f32 %v335_v50, %v1506_v7  ;;  %v339_v59 = vmul.f32 0.6931472, %v1073_v10 }
 0x222   :  { %v395_v3 = vadd.f32 %v337_v2, %v1508_v55  ;;  %v1075_v55 = vpop.eup %1074  ;;  %1094 = vlog2.f32 %v1731_v37 }
 0x223   :  { %v874_v56 = vmul.f32 0.0, %v680_v58  ;;  %v396_v38 = vadd.f32 %v339_v59, %v1514_v63  ;;  %v1077_v63 = vpop.eup %1076  ;;  %v341_v61 = vmul.f32 0.6931472, %v1075_v55  ;;  %1096 = vlog2.f32 %v1745_v29 }
 0x224   :  { %v1079_v62 = vpop.eup %1078  ;;  %v343_v50 = vmul.f32 0.6931472, %v1077_v63  ;;  %1098 = vlog2.f32 %v1738_v33  ;;  %v2026_v63 = vld [vmem:[#allocation48_spill] sm:$0xff] }
 0x225   :  { %v1081_v53 = vpop.eup %1080  ;;  %v345_v46 = vmul.f32 0.6931472, %v1079_v62  ;;  %v397_v42 = vadd.f32 %v341_v61, %v2022_v54  ;;  %1100 = vlog2.f32 %v1755_v25 }
 0x226   :  { %v1083_v49 = vpop.eup %1082  ;;  %v398_v34 = vadd.f32 %v343_v50, %v1522_v14  ;;  %v347_v57 = vmul.f32 0.6931472, %v1081_v53  ;;  %1102 = vlog2.f32 %v1743_v22  ;;  %v2024_v22 = vld [vmem:[#allocation26_spill] sm:$0xff] }
 0x227   :  { %v1085_v1 = vpop.eup %1084  ;;  %v349_v58 = vmul.f32 0.6931472, %v1083_v49  ;;  %v399_v24 = vadd.f32 %v345_v46, %v1524_v39  ;;  %1104 = vlog2.f32 %v1764_v52  ;;  %v2027_v49 = vld [vmem:[#allocation45_spill] sm:$0xff] }
 0x228   :  { %v623_v31 = vpop.xlane.xlu0 %622  ;;  %v1087_v41 = vpop.eup %1086  ;;  %v351_v26 = vmul.f32 0.6931472, %v1085_v1 }
 0x229   :  { %v682_v36 = vsub.f32 %v394_v13, %v623_v31  ;;  %v1089_v37 = vpop.eup %1088  ;;  %v353_v13 = vmul.f32 0.6931472, %v1087_v41  ;;  %v401_v31 = vadd.f32 %v349_v58, %v1532_v43  ;;  %v2029_v58 = vld [vmem:[#allocation29_spill] sm:$0xff] }
 0x22a   :  { %v1091_v2 = vpop.eup %1090  ;;  %v402_v33 = vadd.f32 %v351_v26, %v1538_v8  ;;  %v2030_v41 = vld [vmem:[#allocation49_spill] sm:$0xff] }
 0x22b   :  { %v876_v16 = vmul.f32 0.0, %v682_v36  ;;  %v355_v36 = vmul.f32 0.6931472, %v1089_v37 }
 0x22d   :  { %v404_v8 = vadd.f32 %v355_v36, %v2024_v22  ;;  %v2037_v22 = vld [vmem:[#allocation50_spill] sm:$0xff] }
 0x230   :  { %v627_v0 = vpop.xlane.xlu0 %626 }
 0x231   :  { %v684_v7 = vsub.f32 %v396_v38, %v627_v0 }
 0x233   :  { %v878_v20 = vmul.f32 0.0, %v684_v7 }
 0x236   :  { %v615_v28 = vpop.xlane.xlu1 %614 }
 0x237   :  { %v678_v15 = vsub.f32 %v390_v44, %v615_v28 }
 0x239   :  { %v904_v6 = vadd.f32 %v679_v27, %v678_v15 }
 0x23a   :  { %v621_v35 = vpop.xlane.xlu1 %620 }
 0x23b   :  { %v905_v12 = vadd.f32 %v904_v6, %v874_v56  ;;  %v681_v47 = vsub.f32 %v393_v32, %v621_v35  ;;  %v400_v32 = vadd.f32 %v347_v57, %v1530_v9  ;;  %v403_v9 = vadd.f32 %v353_v13, %v1540_v51 }
 0x23d   :  { %v875_v40 = vmul.f32 0.0, %v681_v47  ;;  %v357_v47 = vmul.f32 0.6931472, %v1091_v2 }
 0x23e   :  { %v625_v4 = vpop.xlane.xlu1 %624 }
 0x23f   :  { %v906_v11 = vadd.f32 %v905_v12, %v875_v40  ;;  %v683_v17 = vsub.f32 %v395_v3, %v625_v4  ;;  %v1093_v12 = vpop.eup %1092 }
 0x240   :  { %v1095_v38 = vpop.eup %1094 }
 0x241   :  { %v877_v48 = vmul.f32 0.0, %v683_v17  ;;  %v907_v19 = vadd.f32 %v906_v11, %v876_v16  ;;  %v359_v11 = vmul.f32 0.6931472, %v1093_v12  ;;  %v2023_v17 = vld [vmem:[#allocation44_spill] sm:$0xff] }
 0x242   :  { %1106 = vlog2.f32 %v2023_v17 }
 0x243   :  { %v908_v60 = vadd.f32 %v907_v19, %v877_v48  ;;  %v1097_v48 = vpop.eup %1096  ;;  %v361_v19 = vmul.f32 0.6931472, %v1095_v38  ;;  %1108 = vlog2.f32 %v2026_v63  ;;  %v2034_v38 = vld [vmem:[#allocation47_spill] sm:$0xff] }
 0x244   :  { %v1099_v55 = vpop.eup %1098  ;;  %1110 = vlog2.f32 %v2027_v49 }
 0x245   :  { %v909_v21 = vadd.f32 %v908_v60, %v878_v20  ;;  %v1101_v54 = vpop.eup %1100  ;;  %1112 = vlog2.f32 %v2030_v41 }
 0x246   :  { %v367_v13 = vmul.f32 0.6931472, %v1101_v54 }
 0x265   :  { %v629_v23 = vpop.xlane.xlu1 %628 }
 0x266   :  { %v685_v45 = vsub.f32 %v397_v42, %v629_v23  ;;  %v363_v42 = vmul.f32 0.6931472, %v1097_v48  ;;  %v2028_v23 = vld [vmem:[#allocation28_spill] sm:$0xff] }
 0x268   :  { %v879_v30 = vmul.f32 0.0, %v685_v45  ;;  %v406_v45 = vadd.f32 %v359_v11, %v2028_v23 }
 0x269   :  { %v633_v44 = vpop.xlane.xlu1 %632  ;;  %v631_v10 = vpop.xlane.xlu0 %630 }
 0x26a   :  { %v910_v28 = vadd.f32 %v909_v21, %v879_v30  ;;  %v687_v27 = vsub.f32 %v399_v24, %v633_v44  ;;  %v686_v15 = vsub.f32 %v398_v34, %v631_v10  ;;  %v2025_v21 = vld [vmem:[#allocation27_spill] sm:$0xff]  ;;  %v365_v34 = vmul.f32 0.6931472, %v1099_v55  ;;  %v1103_v24 = vpop.eup %1102  ;;  %v2038_v55 = vld [vmem:[#allocation34_spill] sm:$0xff] }
 0x26b   :  { %v405_v51 = vadd.f32 %v357_v47, %v2025_v21  ;;  %v407_v30 = vadd.f32 %v361_v19, %v2029_v58  ;;  %v1105_v37 = vpop.eup %1104  ;;  %v369_v2 = vmul.f32 0.6931472, %v1103_v24  ;;  %v2040_v58 = vld [vmem:[#allocation36_spill] sm:$0xff] }
 0x26c   :  { %v880_v14 = vmul.f32 0.0, %v686_v15  ;;  %v881_v56 = vmul.f32 0.0, %v687_v27 }
 0x26d   :  { %v637_v39 = vpop.xlane.xlu1 %636  ;;  %v635_v59 = vpop.xlane.xlu0 %634 }
 0x26e   :  { %v911_v29 = vadd.f32 %v910_v28, %v880_v14  ;;  %v689_v6 = vsub.f32 %v401_v31, %v637_v39  ;;  %v688_v35 = vsub.f32 %v400_v32, %v635_v59  ;;  %v2031_v14 = vld [vmem:[#allocation46_spill] sm:$0xff] }
 0x26f   :  { %1114 = vlog2.f32 %v2031_v14  ;;  %v2032_v31 = vld [vmem:[#allocation30_spill] sm:$0xff] }
 0x270   :  { %v912_v0 = vadd.f32 %v911_v29, %v881_v56  ;;  %v882_v43 = vmul.f32 0.0, %v688_v35  ;;  %v883_v3 = vmul.f32 0.0, %v689_v6  ;;  %v408_v32 = vadd.f32 %v363_v42, %v2032_v31  ;;  %v2033_v56 = vld [vmem:[#allocation31_spill] sm:$0xff]  ;;  %v1107_v6 = vpop.eup %1106 }
 0x271   :  { %v641_v25 = vpop.xlane.xlu1 %640  ;;  %v639_v40 = vpop.xlane.xlu0 %638  ;;  %v409_v29 = vadd.f32 %v365_v34, %v2033_v56  ;;  %1116 = vlog2.f32 %v1776_v18 }
 0x272   :  { %v913_v4 = vadd.f32 %v912_v0, %v882_v43  ;;  %v691_v16 = vsub.f32 %v403_v9, %v641_v25  ;;  %v690_v7 = vsub.f32 %v402_v33, %v639_v40  ;;  %v1109_v43 = vpop.eup %1108  ;;  %v371_v9 = vmul.f32 0.6931472, %v1105_v37  ;;  %v2035_v25 = vld [vmem:[#allocation32_spill] sm:$0xff] }
 0x273   :  { %1118 = vlog2.f32 %v2034_v38  ;;  %v410_v40 = vadd.f32 %v367_v13, %v2035_v25  ;;  %v1111_v17 = vpop.eup %1110  ;;  %v2044_v25 = vld [vmem:[#allocation40_spill] sm:$0xff] }
 0x274   :  { %v914_v20 = vadd.f32 %v913_v4, %v883_v3  ;;  %v884_v60 = vmul.f32 0.0, %v690_v7  ;;  %v885_v62 = vmul.f32 0.0, %v691_v16  ;;  %v373_v3 = vmul.f32 0.6931472, %v1107_v6  ;;  %v2036_v7 = vld [vmem:[#allocation33_spill] sm:$0xff]  ;;  %v1113_v21 = vpop.eup %1112  ;;  %v2043_v6 = vld [vmem:[#allocation39_spill] sm:$0xff] }
 0x275   :  { %v645_v52 = vpop.xlane.xlu1 %644  ;;  %v643_v61 = vpop.xlane.xlu0 %642  ;;  %v411_v11 = vadd.f32 %v369_v2, %v2036_v7  ;;  %1120 = vlog2.f32 %v2037_v22  ;;  %v412_v63 = vadd.f32 %v371_v9, %v2038_v55  ;;  %v2042_v2 = vld [vmem:[#allocation38_spill] sm:$0xff]  ;;  %v2045_v7 = vld [vmem:[#allocation41_spill] sm:$0xff] }
 0x276   :  { %v915_v50 = vadd.f32 %v914_v20, %v884_v60  ;;  %v693_v53 = vsub.f32 %v405_v51, %v645_v52  ;;  %v692_v46 = vsub.f32 %v404_v8, %v643_v61  ;;  %v375_v51 = vmul.f32 0.6931472, %v1109_v43  ;;  %v2047_v55 = vld [vmem:[#allocation42_spill] sm:$0xff] }
 0x277   :  { %1122 = vlog2.f32 %v1790_v5  ;;  %v377_v52 = vmul.f32 0.6931472, %v1111_v17 }
 0x278   :  { %v916_v1 = vadd.f32 %v915_v50, %v885_v62  ;;  %v886_v57 = vmul.f32 0.0, %v692_v46  ;;  %v887_v28 = vmul.f32 0.0, %v693_v53  ;;  %v2039_v50 = vld [vmem:[#allocation35_spill] sm:$0xff] }
 0x279   :  { %v649_v44 = vpop.xlane.xlu1 %648  ;;  %v647_v10 = vpop.xlane.xlu0 %646  ;;  %v413_v53 = vadd.f32 %v373_v3, %v2039_v50 }
 0x27a   :  { %v917_v27 = vadd.f32 %v916_v1, %v886_v57  ;;  %v695_v15 = vsub.f32 %v407_v30, %v649_v44  ;;  %v694_v26 = vsub.f32 %v406_v45, %v647_v10  ;;  %v1115_v46 = vpop.eup %1114  ;;  %v379_v57 = vmul.f32 0.6931472, %v1113_v21  ;;  %v2041_v44 = vld [vmem:[#allocation37_spill] sm:$0xff]  ;;  %v2046_v21 = vld [vmem:[#allocation43_spill] sm:$0xff] }
 0x27b   :  { %v1117_v1 = vpop.eup %1116  ;;  %v414_v30 = vadd.f32 %v375_v51, %v2040_v58  ;;  %v381_v24 = vmul.f32 0.6931472, %v1115_v46  ;;  %v415_v10 = vadd.f32 %v377_v52, %v2041_v44 }
 0x27c   :  { %v918_v39 = vadd.f32 %v917_v27, %v887_v28  ;;  %v888_v59 = vmul.f32 0.0, %v694_v26  ;;  %v889_v33 = vmul.f32 0.0, %v695_v15 }
 0x27d   :  { %v653_v35 = vpop.xlane.xlu1 %652  ;;  %v651_v36 = vpop.xlane.xlu0 %650 }
 0x27e   :  { %v919_v12 = vadd.f32 %v918_v39, %v888_v59  ;;  %v697_v47 = vsub.f32 %v409_v29, %v653_v35  ;;  %v696_v0 = vsub.f32 %v408_v32, %v651_v36  ;;  %v1119_v28 = vpop.eup %1118  ;;  %v383_v32 = vmul.f32 0.6931472, %v1117_v1 }
 0x27f   :  { %v1121_v31 = vpop.eup %1120  ;;  %v416_v39 = vadd.f32 %v379_v57, %v2042_v2  ;;  %v385_v59 = vmul.f32 0.6931472, %v1119_v28  ;;  %v417_v35 = vadd.f32 %v381_v24, %v2043_v6 }
 0x280   :  { %v920_v4 = vadd.f32 %v919_v12, %v889_v33  ;;  %v890_v16 = vmul.f32 0.0, %v696_v0  ;;  %v891_v48 = vmul.f32 0.0, %v697_v47  ;;  %v387_v38 = vmul.f32 0.6931472, %v1121_v31 }
 0x281   :  { %v657_v18 = vpop.xlane.xlu1 %656  ;;  %v655_v8 = vpop.xlane.xlu0 %654 }
 0x282   :  { %v921_v19 = vadd.f32 %v920_v4, %v890_v16  ;;  %v699_v20 = vsub.f32 %v411_v11, %v657_v18  ;;  %v698_v60 = vsub.f32 %v410_v40, %v655_v8  ;;  %v1123_v36 = vpop.eup %1122  ;;  %v418_v40 = vadd.f32 %v383_v32, %v2044_v25 }
 0x283   :  { %v389_v3 = vmul.f32 0.6931472, %v1123_v36  ;;  %v419_v11 = vadd.f32 %v385_v59, %v2045_v7 }
 0x284   :  { %v922_v61 = vadd.f32 %v921_v19, %v891_v48  ;;  %v892_v62 = vmul.f32 0.0, %v698_v60  ;;  %v893_v49 = vmul.f32 0.0, %v699_v20 }
 0x285   :  { %v661_v54 = vpop.xlane.xlu1 %660  ;;  %v659_v42 = vpop.xlane.xlu0 %658  ;;  %v421_v51 = vadd.f32 %v389_v3, %v2046_v21 }
 0x286   :  { %v923_v23 = vadd.f32 %v922_v61, %v892_v62  ;;  %v701_v45 = vsub.f32 %v413_v53, %v661_v54  ;;  %v700_v34 = vsub.f32 %v412_v63, %v659_v42  ;;  %v420_v63 = vadd.f32 %v387_v38, %v2047_v55 }
 0x288   :  { %v924_v5 = vadd.f32 %v923_v23, %v893_v49  ;;  %v894_v41 = vmul.f32 0.0, %v700_v34  ;;  %v895_v26 = vmul.f32 0.0, %v701_v45 }
 0x289   :  { %v665_v27 = vpop.xlane.xlu1 %664  ;;  %v663_v15 = vpop.xlane.xlu0 %662 }
 0x28a   :  { %v925_v37 = vadd.f32 %v924_v5, %v894_v41  ;;  %v703_v13 = vsub.f32 %v415_v10, %v665_v27  ;;  %v702_v14 = vsub.f32 %v414_v30, %v663_v15 }
 0x28c   :  { %v926_v56 = vadd.f32 %v925_v37, %v895_v26  ;;  %v896_v29 = vmul.f32 0.0, %v702_v14  ;;  %v897_v47 = vmul.f32 0.0, %v703_v13 }
 0x28d   :  { %v669_v33 = vpop.xlane.xlu1 %668  ;;  %v667_v12 = vpop.xlane.xlu0 %666 }
 0x28e   :  { %v927_v0 = vadd.f32 %v926_v56, %v896_v29  ;;  %v705_v43 = vsub.f32 %v417_v35, %v669_v33  ;;  %v704_v9 = vsub.f32 %v416_v39, %v667_v12 }
 0x290   :  { %v928_v4 = vadd.f32 %v927_v0, %v897_v47  ;;  %v898_v16 = vmul.f32 0.0, %v704_v9  ;;  %v899_v18 = vmul.f32 0.0, %v705_v43 }
 0x291   :  { %v673_v17 = vpop.xlane.xlu1 %672  ;;  %v671_v22 = vpop.xlane.xlu0 %670 }
 0x292   :  { %v929_v8 = vadd.f32 %v928_v4, %v898_v16  ;;  %v707_v48 = vsub.f32 %v419_v11, %v673_v17  ;;  %v706_v19 = vsub.f32 %v418_v40, %v671_v22 }
 0x294   :  { %v930_v20 = vadd.f32 %v929_v8, %v899_v18  ;;  %v900_v60 = vmul.f32 0.0, %v706_v19  ;;  %v901_v62 = vmul.f32 0.0, %v707_v48 }
 0x295   :  { %v677_v52 = vpop.xlane.xlu1 %676  ;;  %v675_v61 = vpop.xlane.xlu0 %674 }
 0x296   :  { %v931_v50 = vadd.f32 %v930_v20, %v900_v60  ;;  %v709_v53 = vsub.f32 %v421_v51, %v677_v52  ;;  %v708_v46 = vsub.f32 %v420_v63, %v675_v61 }
 0x298   :  { %v932_v54 = vadd.f32 %v931_v50, %v901_v62  ;;  %v902_v42 = vmul.f32 0.0, %v708_v46  ;;  %v903_v49 = vmul.f32 0.0, %v709_v53 }
 0x29a   :  { %v933_v23 = vadd.f32 %v932_v54, %v902_v42 }
 0x29c   :  { %v934_v45 = vadd.f32 %v933_v23, %v903_v49 }
 0x29e   :  { %v935_v34 = vrot.slane %v934_v45, 4 }
 0x2a0   :  { %v936_v1 = vadd.f32 %v935_v34, %v934_v45 }
 0x2a2   :  { %v937_v57 = vrot.slane %v936_v1, 2 }
 0x2a4   :  { %v938_v58 = vadd.f32 %v937_v57, %v936_v1 }
 0x2a6   :  { %v939_v30 = vrot.slane %v938_v58, 1 }
 0x2a8   :  { %v940_v24 = vadd.f32 %v939_v30, %v938_v58 }
 0x2aa   :  { %942 = vst.msk [vmem:[#allocation6] sm:$0x1] %vm941_vm1, %v940_v24 }
 0x2ab   :  { %1169 = shalt.err (!%p1166_p4)
}
 0x2ac   :  { %s1170_s23 = scalar_lea.hbm %s1934_s4, 16 }
 0x2ad   :  { %p1171_p5 = scmp.ne.s32.totalorder %s1934_s4, %s1170_s23  ;;  %p1174_p6 = scmp.lt.u32.totalorder %s1170_s23, %s1934_s4 }
 0x2af   :  { %p1176_p7 = pnand %p1174_p6, %p1171_p5 }
 0x2b1   :  { %1179 = shalt.err (!%p1176_p7)
}
 0x2b2   :  { %964 = dma.vmem_to_hbm [thread:$0]  %s962_s19, 16, %s1934_s4, [#allocation7]  }
 0x2b3   :  { %1186 = dma.done.wait [#allocation5], 4096  }
 0x2b4   :  { %1187 = vsyncadd [#allocation5], 4294963200 }
 0x2b5   :  { %1188 = dma.done.wait [#allocation7], 16  }
 0x2b6   :  { %1189 = vsyncadd [#allocation7], 4294967280 }
 0x2b7   :  { %971 = vsyncpa [#allocation5], 1 }
 0x2b8   :  { %972 = vsyncpa [#allocation7], 1 }

</bundles_post_ra>
